<compile_context>
chip_gen: v6e
topology: v6e:2x2x1
jax: 0.10.0
libtpu: 0.0.40
codegen_flags: <defaults>
</compile_context>

<pallas_src>
import jax
import jax.numpy as jnp
from jax.experimental import pallas as pl
from jax.experimental.pallas import tpu as pltpu


def _round_up(a: int, b: int) -> int:
    return (a + b - 1) // b * b


def _pick_tile(dim_padded: int, align: int, cap: int) -> int:
    """Largest multiple of `align` that divides `dim_padded` and is <= cap."""
    best = align
    t = align
    limit = min(cap, dim_padded)
    while t <= limit:
        if dim_padded % t == 0:
            best = t
        t += align
    return best


def _vmem_budgets():
    """Returns (single_pass_budget_bytes, vmem_limit_bytes), generation-aware."""
    cap = None
    try:
        info = pltpu.get_tpu_info()
        cap = getattr(info, "vmem_capacity_bytes", None)
    except Exception:
        cap = None
    if cap is None:
        cap = 64 * 1024 * 1024  # assume the smallest (v7x per-TC) if unknown
    if cap <= 64 * 1024 * 1024:
        # v7x: 64 MiB per TC -> leave headroom for Mosaic internal scratch.
        return 18 * 1024 * 1024, 32 * 1024 * 1024
    # v5e / v6e: 128 MiB physical VMEM -> allow large resident weight slabs.
    return 56 * 1024 * 1024, 96 * 1024 * 1024


def _conv1d_kernel_single(x_ref, w_ref, b_ref, o_ref):
    """Single pass over K: one MXU matmul + fused bias, written exactly once."""
    o_ref[...] = (
        jnp.dot(x_ref[...], w_ref[...], preferred_element_type=jnp.float32)
        + b_ref[...]
    ).astype(o_ref.dtype)


def _conv1d_kernel_acc_inplace(x_ref, w_ref, b_ref, o_ref):
    """K-tiled; f32 output block is resident across k -> accumulate in place."""
    k = pl.program_id(2)

    @pl.when(k == 0)
    def _():
        o_ref[...] = jnp.broadcast_to(b_ref[...], o_ref.shape)

    o_ref[...] += jnp.dot(
        x_ref[...], w_ref[...], preferred_element_type=jnp.float32
    )


def _conv1d_kernel_acc_scratch(x_ref, w_ref, b_ref, o_ref, acc_ref):
    """K-tiled with f32 scratch accumulator (non-f32 output dtypes)."""
    k = pl.program_id(2)

    @pl.when(k == 0)
    def _():
        acc_ref[...] = jnp.broadcast_to(
            b_ref[...].astype(jnp.float32), acc_ref.shape
        )

    acc_ref[...] += jnp.dot(
        x_ref[...], w_ref[...], preferred_element_type=jnp.float32
    )

    @pl.when(k == pl.num_programs(2) - 1)
    def _():
        o_ref[...] = acc_ref[...].astype(o_ref.dtype)


def conv1d_forward(x, weight, bias, *, use_bf16: bool = False):
    """out = x @ weight + bias  with TPU-friendly adaptive, divisor-based tiling."""
    M, K = x.shape
    K2, N = weight.shape
    assert K == K2 and bias.shape == (N,)
    out_dtype = x.dtype

    budget, vmem_limit = _vmem_budgets()

    # Opt-in bf16 compute path (MXU native fast path; halves HBM/VMEM bytes).
    # Off by default so results match torch.addmm float32 numerics.
    if use_bf16:
        x_c = x.astype(jnp.bfloat16)
        w_c = weight.astype(jnp.bfloat16)
        align_m = 16  # bf16 sublane packing
    else:
        x_c, w_c = x, weight
        align_m = 8
    eb = jnp.dtype(x_c.dtype).itemsize   # x / weight element bytes
    ob = jnp.dtype(out_dtype).itemsize   # output element bytes

    # ---- divisor-based tile selection (pad only to 128 / sublane alignment) ----
    Np = _round_up(N, 128)
    Mp = _round_up(M, align_m)
    Kp = _round_up(K, 128)

    tn = _pick_tile(Np, 128, 512)        # lane-dense output tile, divides Np
    tm = _pick_tile(Mp, align_m, 256)

    # Megacore (v7x): make sure there are >=2 tiles along the parallel axes so
    # both TensorCores split the weight read even in the M==1 GEMV case.
    if Mp // tm == 1 and Np // tn == 1 and Np > 128:
        tn = _pick_tile(Np, 128, max(128, tn // 2))

    # Single-pass footprint: double-buffered x/w/out tiles (+ tiny bias).
    bytes_single = (2 * tm * Kp + 2 * Kp * tn) * eb + 2 * tm * tn * ob + 2 * tn * 4
    use_k_axis = bytes_single > budget

    if use_k_axis:
        # Bigger tm cuts weight re-reads: total weight HBM traffic ~ (Mp/tm)*K*N.
        tm = _pick_tile(Mp, align_m, 512)
        tk = _pick_tile(Kp, 128, 2048)
        while True:
            footprint = (
                (2 * tm * tk + 2 * tk * tn) * eb + 3 * tm * tn * 4 + 2 * tn * 4
            )
            if footprint <= budget or tk == 128:
                break
            tk = _pick_tile(Kp, 128, tk - 128)
    else:
        tk = Kp

    # ---- zero-pad to alignment only (zeros are neutral for x @ w + bias) ----
    if (Mp, Kp) != (M, K):
        x_c = jnp.pad(x_c, ((0, Mp - M), (0, Kp - K)))
    if (Kp, Np) != (K, N):
        w_c = jnp.pad(w_c, ((0, Kp - K), (0, Np - N)))
    bias_f32 = bias.astype(jnp.float32)
    if Np != N:
        bias_f32 = jnp.pad(bias_f32, (0, Np - N))
    bias2d = bias_f32.reshape(1, Np)

    gm = Mp // tm  # weight is re-DMA'd once per i sweep
    cost = pl.CostEstimate(
        flops=2 * M * N * K,
        transcendentals=0,
        bytes_accessed=eb * M * K + eb * gm * K * N + 4 * N + ob * M * N,
    )

    if use_k_axis:
        grid = (Mp // tm, Np // tn, Kp // tk)
        in_specs = [
            pl.BlockSpec((tm, tk), lambda i, j, k: (i, k)),  # x tile
            pl.BlockSpec((tk, tn), lambda i, j, k: (k, j)),  # w tile
            pl.BlockSpec((1, tn), lambda i, j, k: (0, j)),   # bias tile
        ]
        out_spec = pl.BlockSpec((tm, tn), lambda i, j, k: (i, j))
        if jnp.dtype(out_dtype) == jnp.dtype(jnp.float32):
            kernel, scratch = _conv1d_kernel_acc_inplace, []
        else:
            kernel, scratch = (
                _conv1d_kernel_acc_scratch,
                [pltpu.VMEM((tm, tn), jnp.float32)],
            )
        out = pl.pallas_call(
            kernel,
            out_shape=jax.ShapeDtypeStruct((Mp, Np), out_dtype),
            grid_spec=pltpu.PrefetchScalarGridSpec(
                num_scalar_prefetch=0,
                grid=grid,
                in_specs=in_specs,
                out_specs=out_spec,
                scratch_shapes=scratch,
            ),
            compiler_params=pltpu.CompilerParams(
                dimension_semantics=("parallel", "parallel", "arbitrary"),
                vmem_limit_bytes=vmem_limit,
            ),
            cost_estimate=cost,
        )(x_c, w_c, bias2d)
    else:
        grid = (Mp // tm, Np // tn)
        out = pl.pallas_call(
            _conv1d_kernel_single,
            out_shape=jax.ShapeDtypeStruct((Mp, Np), out_dtype),
            grid_spec=pltpu.PrefetchScalarGridSpec(
                num_scalar_prefetch=0,
                grid=grid,
                in_specs=[
                    pl.BlockSpec((tm, Kp), lambda i, j: (i, 0)),  # full-K x rows
                    pl.BlockSpec((Kp, tn), lambda i, j: (0, j)),  # full-K w cols
                    pl.BlockSpec((1, tn), lambda i, j: (0, j)),   # bias tile
                ],
                out_specs=pl.BlockSpec((tm, tn), lambda i, j: (i, j)),
            ),
            compiler_params=pltpu.CompilerParams(
                dimension_semantics=("parallel", "parallel"),
                vmem_limit_bytes=vmem_limit,
            ),
            cost_estimate=cost,
        )(x_c, w_c, bias2d)

    if (Mp, Np) != (M, N):
        out = out[:M, :N]
    return out


if __name__ == "__main__":
    # Shapes follow the PyTorch spec: nx = 768, batch_size = 1, square Conv1D.
    batch_size = 1
    nx = 768
    nf = 768

    key = jax.random.PRNGKey(0)
    kx, kw, kb = jax.random.split(key, 3)

    # Deterministic init matching Conv1D.__init__:
    #   weight ~ Normal(0, 0.02) of shape (nx, nf); bias ~ Normal(0, 1) of shape (nf,)
    x = jax.random.normal(kx, (batch_size, nx), dtype=jnp.float32)
    weight = 0.02 * jax.random.normal(kw, (nx, nf), dtype=jnp.float32)
    bias = jax.random.normal(kb, (nf,), dtype=jnp.float32)

    out = conv1d_forward(x, weight, bias)  # f32 path matches torch.addmm numerics
    out = jax.block_until_ready(out)

    # Reference: same semantics as torch.addmm(bias, x, weight).
    ref = x @ weight + bias
    assert out.shape == (batch_size, nf)
    assert jnp.allclose(out, ref, atol=1e-5, rtol=1e-5)

    print("KERNEL_OK")
</pallas_src>

<mosaic_0001>
module attributes {stable_mosaic.version = 11 : i64} {
  func.func @_conv1d_kernel_single(%arg0: i32, %arg1: i32, %arg2: memref<8x768xf32, #tpu.memory_space<vmem>>, %arg3: memref<768x384xf32, #tpu.memory_space<vmem>>, %arg4: memref<1x384xf32, #tpu.memory_space<vmem>>, %arg5: memref<8x384xf32, #tpu.memory_space<vmem>>) attributes {dimension_semantics = [#tpu.dimension_semantics<parallel>, #tpu.dimension_semantics<parallel>], iteration_bounds = array<i64: 1, 2>, scalar_prefetch = 0 : i64, scratch_operands = 0 : i64, tpu.core_type = #tpu.core_type<tc>, window_params = [{transform_indices = @transform_0, window_bounds = array<i64: 8, 768>}, {transform_indices = @transform_1, window_bounds = array<i64: 768, 384>}, {transform_indices = @transform_2, window_bounds = array<i64: 1, 384>}, {transform_indices = @transform_3, window_bounds = array<i64: 8, 384>}]} {
    %c0 = arith.constant 0 : index
    %c0_0 = arith.constant 0 : index
    %0 = vector.load %arg2[%c0, %c0_0] : memref<8x768xf32, #tpu.memory_space<vmem>>, vector<8x768xf32>
    %c0_1 = arith.constant 0 : index
    %c0_2 = arith.constant 0 : index
    %1 = vector.load %arg3[%c0_1, %c0_2] : memref<768x384xf32, #tpu.memory_space<vmem>>, vector<768x384xf32>
    %cst = arith.constant dense<0.000000e+00> : vector<8x384xf32>
    %2 = tpu.matmul %0, %1, %cst {dimension_numbers = #tpu.dot_dimension_numbers<[1], [0], [0], [1], [0, 0, 1, 1], [], []>} : vector<8x768xf32>, vector<768x384xf32>, vector<8x384xf32> -> vector<8x384xf32>
    %c0_3 = arith.constant 0 : index
    %c0_4 = arith.constant 0 : index
    %3 = vector.load %arg4[%c0_3, %c0_4] : memref<1x384xf32, #tpu.memory_space<vmem>>, vector<1x384xf32>
    %4 = vector.broadcast %3 : vector<1x384xf32> to vector<8x384xf32>
    %5 = arith.addf %2, %4 : vector<8x384xf32>
    %c0_5 = arith.constant 0 : index
    %c0_6 = arith.constant 0 : index
    %6 = vector.load %arg5[%c0_5, %c0_6] : memref<8x384xf32, #tpu.memory_space<vmem>>, vector<8x384xf32>
    tpu.vector_store %arg5[%c0_5, %c0_6], %5 {strides = array<i32>} : memref<8x384xf32, #tpu.memory_space<vmem>>, vector<8x384xf32>,
    return
  }
  func.func @transform_0(%arg0: i32, %arg1: i32) -> (i32, i32) {
    %c0_i32 = arith.constant 0 : i32
    %c0_i32_0 = arith.constant 0 : i32
    return %arg0, %c0_i32 : i32, i32
  }
  func.func @transform_1(%arg0: i32, %arg1: i32) -> (i32, i32) {
    %c0_i32 = arith.constant 0 : i32
    %c0_i32_0 = arith.constant 0 : i32
    return %c0_i32, %arg1 : i32, i32
  }
  func.func @transform_2(%arg0: i32, %arg1: i32) -> (i32, i32) {
    %c0_i32 = arith.constant 0 : i32
    %c0_i32_0 = arith.constant 0 : i32
    return %c0_i32, %arg1 : i32, i32
  }
  func.func @transform_3(%arg0: i32, %arg1: i32) -> (i32, i32) {
    %c0_i32 = arith.constant 0 : i32
    return %arg0, %arg1 : i32, i32
  }
}

</mosaic_0001>

<bundles_post_ra>
// kernel: tpu_custom_call.1
= control target key start
LH: loop header
LB: loop body
LE: loop exit
PB: predicated region body
PF: predicated region fallthrough
CT: control target
= control target key end

     0   :  { %8 = vsyncpa [#allocation3], 0  ;;  %s2018_s0 = inlined_call_operand.hbm [shape: f32[8,768], index: 0, kind: input, shape index: {}]   ;;  %s2019_s1 = inlined_call_operand.hbm [shape: f32[768,768], index: 1, kind: input, shape index: {}]   ;;  %s2020_s2 = inlined_call_operand.hbm [shape: f32[1,768], index: 2, kind: input, shape index: {}]   ;;  %s2021_s3 = inlined_call_operand.hbm [shape: f32[8,768], index: 3, kind: output, shape index: {}]  }
   0x1   :  { %9 = vsyncpa [#allocation6], 0 }
   0x2   :  { %11 = vsyncpa [#allocation6 + $0x1], 0 }
   0x3   :  { %12 = vsyncpa [#allocation4], 0 }
   0x4   :  { %14 = vsyncpa [#allocation4 + $0x1], 0  ;;  %s1532_s12 = smov 0   ;;  %s1534_s13 = smov 0  }
   0x5   :  { %s1536_s14 = smov 0   ;;  %s1538_s15 = smov 0  }
   0x6   :  { %s1540_s16 = smov 0   ;;  %s1542_s17 = smov 0  }
   0x7 LB: > { %s29_s18 = sadd.s32 1, %s1499_s16  ;;  %s65_s19 = sadd.s32 1, %s1491_s14  ;;  %s1503_s17 = sphi %s1542_s17, %s20_s17   ;;  %s1499_s16 = sphi %s1540_s16, %s2044_s16   ;;  %s1495_s15 = sphi %s1538_s15, %s2043_s15   ;;  %s1491_s14 = sphi %s1536_s14, %s2042_s14   ;;  %s1487_s13 = sphi %s1534_s13, %s2041_s13   ;;  %s1483_s12 = sphi %s1532_s12, %s2040_s12  }
   0x8   : > { %p30_p0 = scmp.ge.s32.totalorder %s29_s18, 2  ;;  %p72_p1 = scmp.ne.s32.totalorder %s1491_s14, %s1487_s13 }
   0x9   : > { %p73_p2 = scmp.eq.s32.totalorder %s1503_s17, 0  ;;  %p1282_p5 = scmp.lt.s32.totalorder %s1503_s17, 2 }
   0xa   : > { %s2046_s18 = smov (%p30_p0, %s29_s18), 0  ;;  %s170_s21 = sand.u32 1, %s1503_s17  }
   0xb   : > { %p74_p4 = por %p73_p2, %p72_p1  ;;  %s62_s20 = ssub.s32 %s1499_s16, %s2046_s18 }
   0xc   : > { %p63_p6 = scmp.eq.s32.totalorder %s62_s20, 0  ;;  %s172_s22 = sand.u32 1, %s1491_s14  }
   0xd   : > { %s1143_s23 = smul.u32 384, %s1499_s16  ;;  %p1587_p7 = pnand %p1282_p5, %p74_p4 }
   0xe   : > { %s1580_s24 = scalar_select %p63_p6, %s1491_s14, %s65_s19  }
   0xf   : > { %s1251_s25 = smul.u32 2304, %s172_s22  ;;  %s180_s28 = scalar_lea.hbm %s2019_s1, %s1143_s23 }
  0x10   : > { %s1591_s5 = scalar_lea.sflag [#allocation6], %s170_s21  ;;  %p2022_p8 = pneg %p1587_p7 }
  0x11   : > { %s174_s30 = scalar_lea.vmem [#allocation5], %s1251_s25  ;;  %s1505_s7 = smov [#allocation5]  }
  0x12   : > { %s181_s4 = sshll.u32 %s174_s30, 4  ;;  %s1355_s8 = sshll.u32 %s1505_s7, 4  ;;  %s182_s4 = int_to_ptr.vmem [resolvable:$true] %s181_s4  ;;  %s1356_s8 = int_to_ptr.vmem [resolvable:$false] %s1355_s8 }
  0x13   : > { %s1350_s6 = scalar_lea.vmem %s182_s4, 36864  ;;  %s1357_s9 = scalar_lea.vmem %s1356_s8, 73728 }
  0x14   : > { %p1351_p9 = scmp.ne.s32.totalorder %s182_s4, %s1350_s6  ;;  %p1358_p12 = scmp.lt.s32.totalorder %s182_s4, %s1356_s8 }
  0x15   : > { %p1359_p13 = scmp.lt.s32.totalorder %s1357_s9, %s1350_s6 }
  0x16   : > { %p1353_p10 = pnand %p1351_p9, %p2022_p8 }
  0x17   : > { %p1360_p0 = por %p1359_p13, %p1358_p12 }
  0x18   : > { %p1354_p11 = pneg %p1353_p10 }
  0x1a   : > { %p1361_p2 = pnand %p1360_p0, %p1354_p11 }
  0x1c   : > { %1364 = shalt.err (!%p1361_p2)
}
  0x1d   : > { %s1506_s10 = smov 768   ;;  %s1507_s11 = smov 384  }
  0x1e   : > { %s1508_s19 = smov 24   ;;  %s1602_s20 = sadd.s32 4294967295, %s1503_s17  }
  0x1f   : > { %1273 = dma.hbm_to_vmem [thread:$0]  (!%p1587_p7), %s180_s28, 36864, %s182_s4, %s1591_s5, %s1506_s10, %s1507_s11, %s1508_s19  }
  0x20   : > { %s1132_s21 = sadd.s32 4294967294, %s1503_s17   ;;  %p78_p4 = scmp.ne.s32.totalorder %s1487_s13, %s1483_s12 }
  0x21   : > { %p2024_p5 = scmp.eq.s32.totalorder %s1602_s20, 0  ;;  %p130_p6 = scmp.eq.s32.totalorder %s1602_s20, 1 }
  0x22   : > { %p136_p9 = scmp.eq.s32.totalorder %s1132_s21, 1  ;;  %p1133_p11 = scmp.ge.s32.totalorder %s1503_s17, 1 }
  0x23   : > { %p1611_p10 = por %p2024_p5, %p78_p4  ;;  %p1619_p12 = por %p130_p6, %p72_p1 }
  0x24   : > { %p1623_p13 = por %p136_p9, %p78_p4  ;;  %p143_p0 = scmp.lt.s32.totalorder %s1503_s17, 3 }
  0x25   : > { %s2028_s23 = scalar_select %p1611_p10, 1, 0 }
  0x26   : > { %s2029_s25 = scalar_select %p1619_p12, 1, 0 }
  0x27   : > { %s2030_s26 = scalar_select %p1623_p13, 1, 0 }
  0x28   : > { %s1252_s27 = smul.u32 3, %s172_s22  ;;  %p1630_p2 = pnand %p1133_p11, %p143_p0 }
  0x29   : > { %s1509_s30 = smov [#allocation2]   ;;  %s1144_s6 = smul.u32 48, %s1499_s16 }
  0x2a   : > { %s2031_s28 = scalar_select %p1630_p2, 1, 0 }
  0x2b   : > { %s159_s4 = sshll.u32 %s1509_s30, 4  ;;  %p1266_p3 = pneg %p1630_p2  ;;  %s160_s4 = int_to_ptr.vmem [resolvable:$true] %s159_s4 }
  0x2c   : > { %s195_s7 = scalar_lea.vmem [#allocation7], %s1252_s27  ;;  %s201_s11 = scalar_lea.hbm %s2020_s2, %s1144_s6 }
  0x2d   : > { %s203_s8 = sshll.u32 %s195_s7, 4  ;;  %p1267_p1 = pnand %p1266_p3, %p2024_p5  ;;  %s204_s8 = int_to_ptr.vmem [resolvable:$true] %s203_s8 }
  0x2e   : > { %s1376_s22 = scalar_lea.vmem %s160_s4, 768  ;;  %p1384_p0 = scmp.lt.s32.totalorder %s160_s4, %s160_s4 }
  0x2f   : > { %p1367_p4 = pneg %p1267_p1  ;;  %p1377_p6 = scmp.ne.s32.totalorder %s160_s4, %s1376_s22 }
  0x30   : > { %p1385_p8 = scmp.lt.s32.totalorder %s1376_s22, %s1376_s22 }
  0x31   : > { %p1379_p9 = pnand %p1377_p6, %p1367_p4 }
  0x32   : > { %p1386_p13 = por %p1385_p8, %p1384_p0 }
  0x33   : > { %p1380_p11 = pneg %p1379_p9 }
  0x35   : > { %p1387_p12 = pnand %p1386_p13, %p1380_p11 }
  0x37   : > { %1390 = shalt.err (!%p1387_p12)
}
  0x38   : > { %1269 = dma.hbm_to_vmem [thread:$0]  (!%p1267_p1), %s2018_s0, 768, %s160_s4, [#allocation3]  }
  0x39   : > { %s1404_s27 = scalar_lea.vmem %s204_s8, 48  ;;  %p2032_p5 = pneg %p1587_p7 }
  0x3a   : > { %p1405_p3 = scmp.ne.s32.totalorder %s204_s8, %s1404_s27  ;;  %s1510_s30 = smov [#allocation7]  }
  0x3b   : > { %s1409_s6 = sshll.u32 %s1510_s30, 4  ;;  %s1410_s6 = int_to_ptr.vmem [resolvable:$false] %s1409_s6 }
  0x3c   : > { %p1407_p10 = pnand %p1405_p3, %p2032_p5  ;;  %s1411_s7 = scalar_lea.vmem %s1410_s6, 96 }
  0x3d   : > { %p1412_p4 = scmp.lt.s32.totalorder %s204_s8, %s1410_s6  ;;  %p1413_p6 = scmp.lt.s32.totalorder %s1411_s7, %s1404_s27 }
  0x3e   : > { %p1408_p2 = pneg %p1407_p10 }
  0x3f   : > { %p1414_p8 = por %p1413_p6, %p1412_p4 }
  0x41   : > { %p1415_p13 = pnand %p1414_p8, %p1408_p2 }
  0x43   : > { %1418 = shalt.err (!%p1415_p13)
}
  0x44   : > { %1276 = dma.hbm_to_vmem [thread:$0]  (!%p1587_p7), %s201_s11, 48, %s204_s8, %s1591_s5  }
  0x45   : > { %p2033_p12 = scmp.ne.s32.totalorder %s2031_s28, 0 }
  0x46   : > { %p2034_p1 = scmp.eq.s32.totalorder (!%p2033_p12), %s1602_s20, 0 }
  0x47   : > { %212 = sbr.rel (%p2033_p12) target bundleno = 460 (0x1cc), region = 32 }
  0x4c   : > { %1470 = dma.done.wait (%p2034_p1), [#allocation3], 768   ;;  %p2035_p5 = pmov %p2034_p1 }
  0x4d   : > { %s218_s4 = sand.u32 1, %s1602_s20   ;;  %s1659_s9 = sand.u32 1, %s1487_s13  }
  0x4e   : > { %1472 = vsyncadd (%p2035_p5), [#allocation3], 4294966528  ;;  %s1253_s10 = smul.u32 2304, %s1659_s9  ;;  %s219_s29 = scalar_lea.sflag [#allocation6], %s218_s4 }
  0x4f   : > { %p2036_p7 = scmp.ne.s32.totalorder %s2028_s23, 0 }
  0x50   : > { %s1662_s22 = scalar_lea.vmem [#allocation5], %s1253_s10 }
  0x51   : > { %1474 = dma.done.wait (%p2036_p7), %s219_s29, 36912  }
  0x52   : > { %1476 = vsyncadd (%p2036_p7), %s219_s29, 4294930384  ;;  %v314_v0 = vld [vmem:[%s1662_s22 + $0x170] sm:$0xff]  ;;  %v313_v2 = vld [vmem:[%s1662_s22 + $0x168] sm:$0xff]  ;;  %s1254_s5 = smul.u32 3, %s1659_s9  ;;  %s1000_s30 = scalar_lea.sflag [#allocation4], %s1659_s9 }
  0x53   : > { %v410_v1 = vld [vmem:[%s1662_s22 + $0x470] sm:$0xff]  ;;  %573 = vmatprep.subr.mxu0 %v314_v0  ;;  %v409_v3 = vld [vmem:[%s1662_s22 + $0x468] sm:$0xff]  ;;  %v311_v4 = vld [vmem:[%s1662_s22 + $0x158] sm:$0xff]  ;;  %s1255_s23 = smul.u32 24, %s1659_s9  ;;  %p2037_p2 = scmp.ne.s32.totalorder %s2029_s25, 0 }
  0x54   : > { %644 = vmatprep.subr.mxu1 %v410_v1  ;;  %v407_v5 = vld [vmem:[%s1662_s22 + $0x458] sm:$0xff]  ;;  %574 = vmatpush1.msra.mxu0 %v313_v2  ;;  %v310_v6 = vld [vmem:[%s1662_s22 + $0x150] sm:$0xff]  ;;  %v308_v8 = vld [vmem:[%s1662_s22 + $0x140] sm:$0xff]  ;;  %s231_s20 = scalar_lea.vmem [#allocation7], %s1254_s5  ;;  %s1145_s8 = smul.u32 384, %s1495_s15 }
  0x55   : > { %645 = vmatpush1.msra.mxu1 %v409_v3  ;;  %v406_v7 = vld [vmem:[%s1662_s22 + $0x450] sm:$0xff]  ;;  %575 = vmatprep.subr.mxu0 %v311_v4  ;;  %v404_v9 = vld [vmem:[%s1662_s22 + $0x440] sm:$0xff]  ;;  %v307_v10 = vld [vmem:[%s1662_s22 + $0x138] sm:$0xff]  ;;  %s258_s28 = scalar_lea.vmem [#allocation8], %s1255_s23  ;;  %s1511_s7 = smov [#allocation8]  }
  0x56   : > { %646 = vmatprep.subr.mxu1 %v407_v5  ;;  %v403_v11 = vld [vmem:[%s1662_s22 + $0x438] sm:$0xff]  ;;  %576 = vmatpush1.msra.mxu0 %v310_v6  ;;  %v305_v12 = vld [vmem:[%s1662_s22 + $0x128] sm:$0xff]  ;;  %v304_v14 = vld [vmem:[%s1662_s22 + $0x120] sm:$0xff]  ;;  %s1016_s11 = sshll.u32 %s258_s28, 4  ;;  %s1014_s27 = scalar_lea.hbm %s2021_s3, %s1145_s8  ;;  %s1017_s11 = int_to_ptr.vmem [resolvable:$true] %s1016_s11 }
  0x57   : > { %647 = vmatpush1.msra.mxu1 %v406_v7  ;;  %v401_v13 = vld [vmem:[%s1662_s22 + $0x428] sm:$0xff]  ;;  %577 = vmatprep.subr.mxu0 %v308_v8  ;;  %v400_v15 = vld [vmem:[%s1662_s22 + $0x420] sm:$0xff]  ;;  %v302_v16 = vld [vmem:[%s1662_s22 + $0x110] sm:$0xff]  ;;  %s1419_s6 = scalar_lea.vmem %s1017_s11, 384  ;;  %s1423_s4 = sshll.u32 %s1511_s7, 4  ;;  %s1424_s4 = int_to_ptr.vmem [resolvable:$false] %s1423_s4 }
  0x58   : > { %648 = vmatprep.subr.mxu1 %v404_v9  ;;  %578 = vmatpush1.msra.mxu0 %v307_v10  ;;  %v398_v17 = vld [vmem:[%s1662_s22 + $0x410] sm:$0xff]  ;;  %v301_v18 = vld [vmem:[%s1662_s22 + $0x108] sm:$0xff]  ;;  %v299_v20 = vld [vmem:[%s1662_s22 + $0xf8] sm:$0xff]  ;;  %p1420_p10 = scmp.ne.s32.totalorder %s1017_s11, %s1419_s6  ;;  %s1425_s15 = scalar_lea.vmem %s1424_s4, 768 }
  0x59   : > { %649 = vmatpush1.msra.mxu1 %v403_v11  ;;  %579 = vmatprep.subr.mxu0 %v305_v12  ;;  %v397_v19 = vld [vmem:[%s1662_s22 + $0x408] sm:$0xff]  ;;  %v395_v21 = vld [vmem:[%s1662_s22 + $0x3f8] sm:$0xff]  ;;  %v298_v22 = vld [vmem:[%s1662_s22 + $0xf0] sm:$0xff]  ;;  %p1426_p0 = scmp.lt.s32.totalorder %s1017_s11, %s1424_s4  ;;  %p1427_p3 = scmp.lt.s32.totalorder %s1425_s15, %s1419_s6 }
  0x5a   : > { %650 = vmatprep.subr.mxu1 %v401_v13  ;;  %580 = vmatpush1.msra.mxu0 %v304_v14  ;;  %v394_v23 = vld [vmem:[%s1662_s22 + $0x3f0] sm:$0xff]  ;;  %v296_v24 = vld [vmem:[%s1662_s22 + $0xe0] sm:$0xff]  ;;  %v295_v26 = vld [vmem:[%s1662_s22 + $0xd8] sm:$0xff]  ;;  %p1421_p9 = pnand %p1420_p10, %p2037_p2 }
  0x5b   : > { %651 = vmatpush1.msra.mxu1 %v400_v15  ;;  %581 = vmatprep.subr.mxu0 %v302_v16  ;;  %v392_v25 = vld [vmem:[%s1662_s22 + $0x3e0] sm:$0xff]  ;;  %v391_v27 = vld [vmem:[%s1662_s22 + $0x3d8] sm:$0xff]  ;;  %v293_v28 = vld [vmem:[%s1662_s22 + $0xc8] sm:$0xff]  ;;  %p1428_p4 = por %p1427_p3, %p1426_p0 }
  0x5c   : > { %652 = vmatprep.subr.mxu1 %v398_v17  ;;  %582 = vmatpush1.msra.mxu0 %v301_v18  ;;  %v389_v29 = vld [vmem:[%s1662_s22 + $0x3c8] sm:$0xff]  ;;  %v292_v30 = vld [vmem:[%s1662_s22 + $0xc0] sm:$0xff]  ;;  %v290_v32 = vld [vmem:[%s1662_s22 + $0xb0] sm:$0xff]  ;;  %p1422_p11 = pneg %p1421_p9 }
  0x5d   : > { %653 = vmatpush1.msra.mxu1 %v397_v19  ;;  %583 = vmatprep.subr.mxu0 %v299_v20  ;;  %v388_v31 = vld [vmem:[%s1662_s22 + $0x3c0] sm:$0xff]  ;;  %v386_v33 = vld [vmem:[%s1662_s22 + $0x3b0] sm:$0xff]  ;;  %v289_v34 = vld [vmem:[%s1662_s22 + $0xa8] sm:$0xff] }
  0x5e   : > { %654 = vmatprep.subr.mxu1 %v395_v21  ;;  %584 = vmatpush1.msra.mxu0 %v298_v22  ;;  %v385_v35 = vld [vmem:[%s1662_s22 + $0x3a8] sm:$0xff]  ;;  %v287_v36 = vld [vmem:[%s1662_s22 + $0x98] sm:$0xff]  ;;  %v286_v38 = vld [vmem:[%s1662_s22 + $0x90] sm:$0xff]  ;;  %p1429_p6 = pnand %p1428_p4, %p1422_p11 }
  0x5f   : > { %655 = vmatpush1.msra.mxu1 %v394_v23  ;;  %585 = vmatprep.subr.mxu0 %v296_v24  ;;  %v383_v37 = vld [vmem:[%s1662_s22 + $0x398] sm:$0xff]  ;;  %v382_v39 = vld [vmem:[%s1662_s22 + $0x390] sm:$0xff]  ;;  %v284_v40 = vld [vmem:[%s1662_s22 + $0x80] sm:$0xff] }
  0x60   : > { %656 = vmatprep.subr.mxu1 %v392_v25  ;;  %586 = vmatpush1.msra.mxu0 %v295_v26  ;;  %v380_v41 = vld [vmem:[%s1662_s22 + $0x380] sm:$0xff]  ;;  %v283_v42 = vld [vmem:[%s1662_s22 + $0x78] sm:$0xff]  ;;  %v281_v44 = vld [vmem:[%s1662_s22 + $0x68] sm:$0xff] }
  0x61   : > { %657 = vmatpush1.msra.mxu1 %v391_v27  ;;  %587 = vmatprep.subr.mxu0 %v293_v28  ;;  %v379_v43 = vld [vmem:[%s1662_s22 + $0x378] sm:$0xff]  ;;  %v377_v45 = vld [vmem:[%s1662_s22 + $0x368] sm:$0xff]  ;;  %v280_v46 = vld [vmem:[%s1662_s22 + $0x60] sm:$0xff] }
  0x62   : > { %658 = vmatprep.subr.mxu1 %v389_v29  ;;  %588 = vmatpush1.msra.mxu0 %v292_v30  ;;  %v376_v47 = vld [vmem:[%s1662_s22 + $0x360] sm:$0xff]  ;;  %v278_v48 = vld [vmem:[%s1662_s22 + $0x50] sm:$0xff]  ;;  %v277_v50 = vld [vmem:[%s1662_s22 + $0x48] sm:$0xff] }
  0x63   : > { %659 = vmatpush1.msra.mxu1 %v388_v31  ;;  %589 = vmatprep.subr.mxu0 %v290_v32  ;;  %v374_v49 = vld [vmem:[%s1662_s22 + $0x350] sm:$0xff]  ;;  %v373_v51 = vld [vmem:[%s1662_s22 + $0x348] sm:$0xff]  ;;  %v275_v52 = vld [vmem:[%s1662_s22 + $0x38] sm:$0xff] }
  0x64   : > { %660 = vmatprep.subr.mxu1 %v386_v33  ;;  %590 = vmatpush1.msra.mxu0 %v289_v34  ;;  %v371_v53 = vld [vmem:[%s1662_s22 + $0x338] sm:$0xff]  ;;  %v274_v54 = vld [vmem:[%s1662_s22 + $0x30] sm:$0xff]  ;;  %v272_v56 = vld [vmem:[%s1662_s22 + $0x20] sm:$0xff] }
  0x65   : > { %661 = vmatpush1.msra.mxu1 %v385_v35  ;;  %591 = vmatprep.subr.mxu0 %v287_v36  ;;  %v370_v55 = vld [vmem:[%s1662_s22 + $0x330] sm:$0xff]  ;;  %v368_v57 = vld [vmem:[%s1662_s22 + $0x320] sm:$0xff]  ;;  %v271_v58 = vld [vmem:[%s1662_s22 + $0x18] sm:$0xff] }
  0x66   : > { %662 = vmatprep.subr.mxu1 %v383_v37  ;;  %592 = vmatpush1.msra.mxu0 %v286_v38  ;;  %v367_v59 = vld [vmem:[%s1662_s22 + $0x318] sm:$0xff]  ;;  %v269_v60 = vld [vmem:[%s1662_s22 + $0x8] sm:$0xff]  ;;  %v268_v62 = vld [vmem:[%s1662_s22] sm:$0xff] }
  0x67   : > { %663 = vmatpush1.msra.mxu1 %v382_v39  ;;  %593 = vmatprep.subr.mxu0 %v284_v40  ;;  %v365_v61 = vld [vmem:[%s1662_s22 + $0x308] sm:$0xff]  ;;  %v364_v63 = vld [vmem:[%s1662_s22 + $0x300] sm:$0xff]  ;;  %v362_v0 = vld [vmem:[%s1662_s22 + $0x2f0] sm:$0xff] }
  0x68   : > { %664 = vmatprep.subr.mxu1 %v380_v41  ;;  %594 = vmatpush1.msra.mxu0 %v283_v42  ;;  %v458_v1 = vld [vmem:[%s1662_s22 + $0x5f0] sm:$0xff]  ;;  %v361_v2 = vld [vmem:[%s1662_s22 + $0x2e8] sm:$0xff]  ;;  %v359_v4 = vld [vmem:[%s1662_s22 + $0x2d8] sm:$0xff] }
  0x69   : > { %665 = vmatpush1.msra.mxu1 %v379_v43  ;;  %595 = vmatprep.subr.mxu0 %v281_v44  ;;  %v457_v3 = vld [vmem:[%s1662_s22 + $0x5e8] sm:$0xff]  ;;  %v455_v5 = vld [vmem:[%s1662_s22 + $0x5d8] sm:$0xff]  ;;  %v358_v6 = vld [vmem:[%s1662_s22 + $0x2d0] sm:$0xff] }
  0x6a   : > { %666 = vmatprep.subr.mxu1 %v377_v45  ;;  %596 = vmatpush1.msra.mxu0 %v280_v46  ;;  %v454_v7 = vld [vmem:[%s1662_s22 + $0x5d0] sm:$0xff]  ;;  %v356_v8 = vld [vmem:[%s1662_s22 + $0x2c0] sm:$0xff]  ;;  %v355_v10 = vld [vmem:[%s1662_s22 + $0x2b8] sm:$0xff] }
  0x6b   : > { %667 = vmatpush1.msra.mxu1 %v376_v47  ;;  %597 = vmatprep.subr.mxu0 %v278_v48  ;;  %v452_v9 = vld [vmem:[%s1662_s22 + $0x5c0] sm:$0xff]  ;;  %v451_v11 = vld [vmem:[%s1662_s22 + $0x5b8] sm:$0xff]  ;;  %v353_v12 = vld [vmem:[%s1662_s22 + $0x2a8] sm:$0xff] }
  0x6c   : > { %668 = vmatprep.subr.mxu1 %v374_v49  ;;  %598 = vmatpush1.msra.mxu0 %v277_v50  ;;  %v449_v13 = vld [vmem:[%s1662_s22 + $0x5a8] sm:$0xff]  ;;  %v352_v14 = vld [vmem:[%s1662_s22 + $0x2a0] sm:$0xff]  ;;  %v350_v16 = vld [vmem:[%s1662_s22 + $0x290] sm:$0xff] }
  0x6d   : > { %669 = vmatpush1.msra.mxu1 %v373_v51  ;;  %599 = vmatprep.subr.mxu0 %v275_v52  ;;  %v448_v15 = vld [vmem:[%s1662_s22 + $0x5a0] sm:$0xff]  ;;  %v446_v17 = vld [vmem:[%s1662_s22 + $0x590] sm:$0xff]  ;;  %v349_v18 = vld [vmem:[%s1662_s22 + $0x288] sm:$0xff] }
  0x6e   : > { %670 = vmatprep.subr.mxu1 %v371_v53  ;;  %600 = vmatpush1.msra.mxu0 %v274_v54  ;;  %v445_v19 = vld [vmem:[%s1662_s22 + $0x588] sm:$0xff]  ;;  %v347_v20 = vld [vmem:[%s1662_s22 + $0x278] sm:$0xff]  ;;  %v346_v22 = vld [vmem:[%s1662_s22 + $0x270] sm:$0xff] }
  0x6f   : > { %671 = vmatpush1.msra.mxu1 %v370_v55  ;;  %601 = vmatprep.subr.mxu0 %v272_v56  ;;  %v443_v21 = vld [vmem:[%s1662_s22 + $0x578] sm:$0xff]  ;;  %v442_v23 = vld [vmem:[%s1662_s22 + $0x570] sm:$0xff]  ;;  %v344_v24 = vld [vmem:[%s1662_s22 + $0x260] sm:$0xff] }
  0x70   : > { %672 = vmatprep.subr.mxu1 %v368_v57  ;;  %602 = vmatpush1.msra.mxu0 %v271_v58  ;;  %v440_v25 = vld [vmem:[%s1662_s22 + $0x560] sm:$0xff]  ;;  %v343_v26 = vld [vmem:[%s1662_s22 + $0x258] sm:$0xff]  ;;  %v341_v28 = vld [vmem:[%s1662_s22 + $0x248] sm:$0xff] }
  0x71   : > { %673 = vmatpush1.msra.mxu1 %v367_v59  ;;  %603 = vmatprep.subr.mxu0 %v269_v60  ;;  %v439_v27 = vld [vmem:[%s1662_s22 + $0x558] sm:$0xff]  ;;  %v437_v29 = vld [vmem:[%s1662_s22 + $0x548] sm:$0xff]  ;;  %v340_v30 = vld [vmem:[%s1662_s22 + $0x240] sm:$0xff] }
  0x72   : > { %674 = vmatprep.subr.mxu1 %v365_v61  ;;  %604 = vmatpush1.msra.mxu0 %v268_v62  ;;  %v436_v31 = vld [vmem:[%s1662_s22 + $0x540] sm:$0xff]  ;;  %v338_v32 = vld [vmem:[%s1662_s22 + $0x230] sm:$0xff]  ;;  %v337_v34 = vld [vmem:[%s1662_s22 + $0x228] sm:$0xff] }
  0x73   : > { %675 = vmatpush1.msra.mxu1 %v364_v63  ;;  %605 = vmatprep.subr.mxu0 %v362_v0  ;;  %v434_v33 = vld [vmem:[%s1662_s22 + $0x530] sm:$0xff]  ;;  %v433_v35 = vld [vmem:[%s1662_s22 + $0x528] sm:$0xff]  ;;  %v335_v36 = vld [vmem:[%s1662_s22 + $0x218] sm:$0xff] }
  0x74   : > { %676 = vmatprep.subr.mxu1 %v458_v1  ;;  %606 = vmatpush2.msra.mxu0 %v361_v2  ;;  %v431_v37 = vld [vmem:[%s1662_s22 + $0x518] sm:$0xff]  ;;  %v334_v38 = vld [vmem:[%s1662_s22 + $0x210] sm:$0xff]  ;;  %v332_v40 = vld [vmem:[%s1662_s22 + $0x200] sm:$0xff] }
  0x75   : > { %677 = vmatpush2.msra.mxu1 %v457_v3  ;;  %607 = vmatprep.subr.mxu0 %v359_v4  ;;  %v430_v39 = vld [vmem:[%s1662_s22 + $0x510] sm:$0xff]  ;;  %v428_v41 = vld [vmem:[%s1662_s22 + $0x500] sm:$0xff]  ;;  %v331_v42 = vld [vmem:[%s1662_s22 + $0x1f8] sm:$0xff] }
  0x76   : > { %678 = vmatprep.subr.mxu1 %v455_v5  ;;  %608 = vmatpush2.msra.mxu0 %v358_v6  ;;  %v427_v43 = vld [vmem:[%s1662_s22 + $0x4f8] sm:$0xff]  ;;  %v329_v44 = vld [vmem:[%s1662_s22 + $0x1e8] sm:$0xff]  ;;  %v328_v46 = vld [vmem:[%s1662_s22 + $0x1e0] sm:$0xff] }
  0x77   : > { %679 = vmatpush2.msra.mxu1 %v454_v7  ;;  %609 = vmatprep.subr.mxu0 %v356_v8  ;;  %v425_v45 = vld [vmem:[%s1662_s22 + $0x4e8] sm:$0xff]  ;;  %v424_v47 = vld [vmem:[%s1662_s22 + $0x4e0] sm:$0xff]  ;;  %v326_v48 = vld [vmem:[%s1662_s22 + $0x1d0] sm:$0xff] }
  0x78   : > { %680 = vmatprep.subr.mxu1 %v452_v9  ;;  %610 = vmatpush2.msra.mxu0 %v355_v10  ;;  %v422_v49 = vld [vmem:[%s1662_s22 + $0x4d0] sm:$0xff]  ;;  %v325_v50 = vld [vmem:[%s1662_s22 + $0x1c8] sm:$0xff]  ;;  %v323_v52 = vld [vmem:[%s1662_s22 + $0x1b8] sm:$0xff] }
  0x79   : > { %681 = vmatpush2.msra.mxu1 %v451_v11  ;;  %611 = vmatprep.subr.mxu0 %v353_v12  ;;  %v421_v51 = vld [vmem:[%s1662_s22 + $0x4c8] sm:$0xff]  ;;  %v419_v53 = vld [vmem:[%s1662_s22 + $0x4b8] sm:$0xff]  ;;  %v322_v54 = vld [vmem:[%s1662_s22 + $0x1b0] sm:$0xff] }
  0x7a   : > { %682 = vmatprep.subr.mxu1 %v449_v13  ;;  %612 = vmatpush2.msra.mxu0 %v352_v14  ;;  %v418_v55 = vld [vmem:[%s1662_s22 + $0x4b0] sm:$0xff]  ;;  %v320_v56 = vld [vmem:[%s1662_s22 + $0x1a0] sm:$0xff]  ;;  %v319_v58 = vld [vmem:[%s1662_s22 + $0x198] sm:$0xff] }
  0x7b   : > { %683 = vmatpush2.msra.mxu1 %v448_v15  ;;  %613 = vmatprep.subr.mxu0 %v350_v16  ;;  %v416_v57 = vld [vmem:[%s1662_s22 + $0x4a0] sm:$0xff]  ;;  %v415_v59 = vld [vmem:[%s1662_s22 + $0x498] sm:$0xff]  ;;  %v317_v60 = vld [vmem:[%s1662_s22 + $0x188] sm:$0xff] }
  0x7c   : > { %684 = vmatprep.subr.mxu1 %v446_v17  ;;  %614 = vmatpush2.msra.mxu0 %v349_v18  ;;  %v413_v61 = vld [vmem:[%s1662_s22 + $0x488] sm:$0xff]  ;;  %v316_v62 = vld [vmem:[%s1662_s22 + $0x180] sm:$0xff]  ;;  %v1795_v63 = vld [vmem:[#allocation2 + $0x8] sm:$0xff] }
  0x7d   : > { %685 = vmatpush2.msra.mxu1 %v445_v19  ;;  %615 = vmatprep.subr.mxu0 %v347_v20  ;;  %v412_v0 = vld [vmem:[%s1662_s22 + $0x480] sm:$0xff]  ;;  %v1798_v1 = vld [vmem:[#allocation2] sm:$0xff]  ;;  %v1800_v2 = vld [vmem:[#allocation2 + $0x18] sm:$0xff] }
  0x7e   : > { %686 = vmatprep.subr.mxu1 %v443_v21  ;;  %616 = vmatpush2.msra.mxu0 %v346_v22  ;;  %v506_v3 = vld [vmem:[%s1662_s22 + $0x770] sm:$0xff]  ;;  %v363_v4 = vld [vmem:[%s1662_s22 + $0x2f8] sm:$0xff]  ;;  %v1805_v5 = vld [vmem:[#allocation2 + $0x10] sm:$0xff] }
  0x7f   : > { %687 = vmatpush2.msra.mxu1 %v442_v23  ;;  %617 = vmatprep.subr.mxu0 %v344_v24  ;;  %v505_v6 = vld [vmem:[%s1662_s22 + $0x768] sm:$0xff]  ;;  %v315_v7 = vld [vmem:[%s1662_s22 + $0x178] sm:$0xff]  ;;  %v360_v9 = vld [vmem:[%s1662_s22 + $0x2e0] sm:$0xff] }
  0x80   : > { %688 = vmatprep.subr.mxu1 %v440_v25  ;;  %618 = vmatpush2.msra.mxu0 %v343_v26  ;;  %v503_v8 = vld [vmem:[%s1662_s22 + $0x758] sm:$0xff]  ;;  %v502_v10 = vld [vmem:[%s1662_s22 + $0x750] sm:$0xff]  ;;  %v312_v11 = vld [vmem:[%s1662_s22 + $0x160] sm:$0xff] }
  0x81   : > { %689 = vmatpush2.msra.mxu1 %v439_v27  ;;  %619 = vmatprep.subr.mxu0 %v341_v28  ;;  %v500_v12 = vld [vmem:[%s1662_s22 + $0x740] sm:$0xff]  ;;  %v357_v13 = vld [vmem:[%s1662_s22 + $0x2c8] sm:$0xff]  ;;  %v499_v14 = vld [vmem:[%s1662_s22 + $0x738] sm:$0xff] }
  0x82   : > { %690 = vmatprep.subr.mxu1 %v437_v29  ;;  %620 = vmatpush2.msra.mxu0 %v340_v30  ;;  %v309_v15 = vld [vmem:[%s1662_s22 + $0x148] sm:$0xff]  ;;  %v354_v17 = vld [vmem:[%s1662_s22 + $0x2b0] sm:$0xff]  ;;  %v496_v18 = vld [vmem:[%s1662_s22 + $0x720] sm:$0xff] }
  0x83   : > { %691 = vmatpush2.msra.mxu1 %v436_v31  ;;  %621 = vmatprep.subr.mxu0 %v338_v32  ;;  %v497_v16 = vld [vmem:[%s1662_s22 + $0x728] sm:$0xff]  ;;  %v306_v19 = vld [vmem:[%s1662_s22 + $0x130] sm:$0xff]  ;;  %v351_v21 = vld [vmem:[%s1662_s22 + $0x298] sm:$0xff] }
  0x84   : > { %692 = vmatprep.subr.mxu1 %v434_v33  ;;  %622 = vmatpush2.msra.mxu0 %v337_v34  ;;  %v494_v20 = vld [vmem:[%s1662_s22 + $0x710] sm:$0xff]  ;;  %v493_v22 = vld [vmem:[%s1662_s22 + $0x708] sm:$0xff]  ;;  %v303_v23 = vld [vmem:[%s1662_s22 + $0x118] sm:$0xff] }
  0x85   : > { %693 = vmatpush2.msra.mxu1 %v433_v35  ;;  %623 = vmatprep.subr.mxu0 %v335_v36  ;;  %v491_v24 = vld [vmem:[%s1662_s22 + $0x6f8] sm:$0xff]  ;;  %v348_v25 = vld [vmem:[%s1662_s22 + $0x280] sm:$0xff]  ;;  %v490_v26 = vld [vmem:[%s1662_s22 + $0x6f0] sm:$0xff] }
  0x86   : > { %694 = vmatprep.subr.mxu1 %v431_v37  ;;  %624 = vmatpush2.msra.mxu0 %v334_v38  ;;  %v300_v27 = vld [vmem:[%s1662_s22 + $0x100] sm:$0xff]  ;;  %v345_v29 = vld [vmem:[%s1662_s22 + $0x268] sm:$0xff]  ;;  %v487_v30 = vld [vmem:[%s1662_s22 + $0x6d8] sm:$0xff] }
  0x87   : > { %695 = vmatpush2.msra.mxu1 %v430_v39  ;;  %625 = vmatprep.subr.mxu0 %v332_v40  ;;  %v488_v28 = vld [vmem:[%s1662_s22 + $0x6e0] sm:$0xff]  ;;  %v297_v31 = vld [vmem:[%s1662_s22 + $0xe8] sm:$0xff]  ;;  %v342_v33 = vld [vmem:[%s1662_s22 + $0x250] sm:$0xff] }
  0x88   : > { %696 = vmatprep.subr.mxu1 %v428_v41  ;;  %626 = vmatpush2.msra.mxu0 %v331_v42  ;;  %v485_v32 = vld [vmem:[%s1662_s22 + $0x6c8] sm:$0xff]  ;;  %v484_v34 = vld [vmem:[%s1662_s22 + $0x6c0] sm:$0xff]  ;;  %v294_v35 = vld [vmem:[%s1662_s22 + $0xd0] sm:$0xff] }
  0x89   : > { %697 = vmatpush2.msra.mxu1 %v427_v43  ;;  %627 = vmatprep.subr.mxu0 %v329_v44  ;;  %v482_v36 = vld [vmem:[%s1662_s22 + $0x6b0] sm:$0xff]  ;;  %v339_v37 = vld [vmem:[%s1662_s22 + $0x238] sm:$0xff]  ;;  %v481_v38 = vld [vmem:[%s1662_s22 + $0x6a8] sm:$0xff] }
  0x8a   : > { %698 = vmatprep.subr.mxu1 %v425_v45  ;;  %628 = vmatpush2.msra.mxu0 %v328_v46  ;;  %v291_v39 = vld [vmem:[%s1662_s22 + $0xb8] sm:$0xff]  ;;  %v336_v41 = vld [vmem:[%s1662_s22 + $0x220] sm:$0xff]  ;;  %v478_v42 = vld [vmem:[%s1662_s22 + $0x690] sm:$0xff] }
  0x8b   : > { %699 = vmatpush2.msra.mxu1 %v424_v47  ;;  %629 = vmatprep.subr.mxu0 %v326_v48  ;;  %v479_v40 = vld [vmem:[%s1662_s22 + $0x698] sm:$0xff]  ;;  %v288_v43 = vld [vmem:[%s1662_s22 + $0xa0] sm:$0xff]  ;;  %v333_v45 = vld [vmem:[%s1662_s22 + $0x208] sm:$0xff] }
  0x8c   : > { %700 = vmatprep.subr.mxu1 %v422_v49  ;;  %630 = vmatpush2.msra.mxu0 %v325_v50  ;;  %v476_v44 = vld [vmem:[%s1662_s22 + $0x680] sm:$0xff]  ;;  %v475_v46 = vld [vmem:[%s1662_s22 + $0x678] sm:$0xff]  ;;  %v285_v47 = vld [vmem:[%s1662_s22 + $0x88] sm:$0xff] }
  0x8d   : > { %701 = vmatpush2.msra.mxu1 %v421_v51  ;;  %631 = vmatprep.subr.mxu0 %v323_v52  ;;  %v473_v48 = vld [vmem:[%s1662_s22 + $0x668] sm:$0xff]  ;;  %v330_v49 = vld [vmem:[%s1662_s22 + $0x1f0] sm:$0xff]  ;;  %v472_v50 = vld [vmem:[%s1662_s22 + $0x660] sm:$0xff] }
  0x8e   : > { %702 = vmatprep.subr.mxu1 %v419_v53  ;;  %632 = vmatpush2.msra.mxu0 %v322_v54  ;;  %v282_v51 = vld [vmem:[%s1662_s22 + $0x70] sm:$0xff]  ;;  %v327_v53 = vld [vmem:[%s1662_s22 + $0x1d8] sm:$0xff]  ;;  %v469_v54 = vld [vmem:[%s1662_s22 + $0x648] sm:$0xff] }
  0x8f   : > { %703 = vmatpush2.msra.mxu1 %v418_v55  ;;  %633 = vmatprep.subr.mxu0 %v320_v56  ;;  %v470_v52 = vld [vmem:[%s1662_s22 + $0x650] sm:$0xff]  ;;  %v279_v55 = vld [vmem:[%s1662_s22 + $0x58] sm:$0xff] }
  0x90   : > { %704 = vmatprep.subr.mxu1 %v416_v57  ;;  %634 = vmatpush2.msra.mxu0 %v319_v58  ;;  %v467_v56 = vld [vmem:[%s1662_s22 + $0x638] sm:$0xff]  ;;  %v324_v57 = vld [vmem:[%s1662_s22 + $0x1c0] sm:$0xff]  ;;  %v466_v58 = vld [vmem:[%s1662_s22 + $0x630] sm:$0xff] }
  0x91   : > { %705 = vmatpush2.msra.mxu1 %v415_v59  ;;  %635 = vmatprep.subr.mxu0 %v317_v60  ;;  %v276_v59 = vld [vmem:[%s1662_s22 + $0x40] sm:$0xff] }
  0x92   : > { %706 = vmatprep.subr.mxu1 %v413_v61  ;;  %636 = vmatpush2.msra.mxu0 %v316_v62  ;;  %v464_v60 = vld [vmem:[%s1662_s22 + $0x620] sm:$0xff]  ;;  %v321_v61 = vld [vmem:[%s1662_s22 + $0x1a8] sm:$0xff]  ;;  %v463_v62 = vld [vmem:[%s1662_s22 + $0x618] sm:$0xff] }
  0x93   : > { %637 = vmatprep.mubr.f32.mxu0 %v1795_v63  ;;  %707 = vmatpush2.msra.mxu1 %v412_v0  ;;  %v273_v0 = vld [vmem:[%s1662_s22 + $0x28] sm:$0xff] }
  0x94   : > { %638 = vmatmul.mubr.f32.vlgmr.msra.gmra.mxu0 %v1798_v1  ;;  %708 = vmatprep.mubr.f32.mxu1 %v1800_v2 }
  0x95   : > { %715 = vmatprep.subr.mxu0 %v506_v3  ;;  %1146 = vmatprep.subr.mxu1 %v363_v4  ;;  %v461_v3 = vld [vmem:[%s1662_s22 + $0x608] sm:$0xff]  ;;  %v318_v4 = vld [vmem:[%s1662_s22 + $0x190] sm:$0xff] }
  0x96   : > { %709 = vmatmul.mubr.f32.vlgmr.msra.gmra.mxu1 %v1805_v5  ;;  %716 = vmatpush1.msra.mxu0 %v505_v6  ;;  %v460_v6 = vld [vmem:[%s1662_s22 + $0x600] sm:$0xff] }
  0x97   : > { %1147 = vmatpush3.msra.mxu1 %v315_v7  ;;  %717 = vmatprep.subr.mxu0 %v503_v8  ;;  %v270_v7 = vld [vmem:[%s1662_s22 + $0x10] sm:$0xff] }
  0x98   : > { %1148 = vmatprep.subr.mxu1 %v360_v9  ;;  %718 = vmatpush1.msra.mxu0 %v502_v10  ;;  %v554_v8 = vld [vmem:[%s1662_s22 + $0x8f0] sm:$0xff]  ;;  %v459_v9 = vld [vmem:[%s1662_s22 + $0x5f8] sm:$0xff]  ;;  %v553_v10 = vld [vmem:[%s1662_s22 + $0x8e8] sm:$0xff] }
  0x99   : > { %1149 = vmatpush3.msra.mxu1 %v312_v11  ;;  %719 = vmatprep.subr.mxu0 %v500_v12  ;;  %v551_v11 = vld [vmem:[%s1662_s22 + $0x8d8] sm:$0xff] }
  0x9a   : > { %1150 = vmatprep.subr.mxu1 %v357_v13  ;;  %720 = vmatpush1.msra.mxu0 %v499_v14  ;;  %v411_v12 = vld [vmem:[%s1662_s22 + $0x478] sm:$0xff]  ;;  %v550_v13 = vld [vmem:[%s1662_s22 + $0x8d0] sm:$0xff]  ;;  %v456_v14 = vld [vmem:[%s1662_s22 + $0x5e0] sm:$0xff] }
  0x9b   : > { %1151 = vmatpush3.msra.mxu1 %v309_v15  ;;  %721 = vmatprep.subr.mxu0 %v497_v16  ;;  %v548_v15 = vld [vmem:[%s1662_s22 + $0x8c0] sm:$0xff] }
  0x9c   : > { %1152 = vmatprep.subr.mxu1 %v354_v17  ;;  %722 = vmatpush1.msra.mxu0 %v496_v18  ;;  %v408_v16 = vld [vmem:[%s1662_s22 + $0x460] sm:$0xff]  ;;  %v547_v17 = vld [vmem:[%s1662_s22 + $0x8b8] sm:$0xff]  ;;  %v545_v18 = vld [vmem:[%s1662_s22 + $0x8a8] sm:$0xff] }
  0x9d   : > { %1153 = vmatpush3.msra.mxu1 %v306_v19  ;;  %723 = vmatprep.subr.mxu0 %v494_v20  ;;  %v405_v19 = vld [vmem:[%s1662_s22 + $0x448] sm:$0xff]  ;;  %v544_v20 = vld [vmem:[%s1662_s22 + $0x8a0] sm:$0xff] }
  0x9e   : > { %1154 = vmatprep.subr.mxu1 %v351_v21  ;;  %724 = vmatpush1.msra.mxu0 %v493_v22  ;;  %v542_v21 = vld [vmem:[%s1662_s22 + $0x890] sm:$0xff] }
  0x9f   : > { %1155 = vmatpush3.msra.mxu1 %v303_v23  ;;  %725 = vmatprep.subr.mxu0 %v491_v24  ;;  %v402_v22 = vld [vmem:[%s1662_s22 + $0x430] sm:$0xff]  ;;  %v541_v23 = vld [vmem:[%s1662_s22 + $0x888] sm:$0xff]  ;;  %v447_v24 = vld [vmem:[%s1662_s22 + $0x598] sm:$0xff] }
  0xa0   : > { %1156 = vmatprep.subr.mxu1 %v348_v25  ;;  %726 = vmatpush1.msra.mxu0 %v490_v26  ;;  %v539_v25 = vld [vmem:[%s1662_s22 + $0x878] sm:$0xff] }
  0xa1   : > { %1157 = vmatpush3.msra.mxu1 %v300_v27  ;;  %727 = vmatprep.subr.mxu0 %v488_v28  ;;  %v399_v26 = vld [vmem:[%s1662_s22 + $0x418] sm:$0xff]  ;;  %v538_v27 = vld [vmem:[%s1662_s22 + $0x870] sm:$0xff]  ;;  %v444_v28 = vld [vmem:[%s1662_s22 + $0x580] sm:$0xff] }
  0xa2   : > { %1158 = vmatprep.subr.mxu1 %v345_v29  ;;  %728 = vmatpush1.msra.mxu0 %v487_v30  ;;  %v536_v29 = vld [vmem:[%s1662_s22 + $0x860] sm:$0xff] }
  0xa3   : > { %1159 = vmatpush3.msra.mxu1 %v297_v31  ;;  %729 = vmatprep.subr.mxu0 %v485_v32  ;;  %v396_v30 = vld [vmem:[%s1662_s22 + $0x400] sm:$0xff]  ;;  %v535_v31 = vld [vmem:[%s1662_s22 + $0x858] sm:$0xff]  ;;  %v441_v32 = vld [vmem:[%s1662_s22 + $0x568] sm:$0xff] }
  0xa4   : > { %1160 = vmatprep.subr.mxu1 %v342_v33  ;;  %730 = vmatpush1.msra.mxu0 %v484_v34  ;;  %v533_v33 = vld [vmem:[%s1662_s22 + $0x848] sm:$0xff] }
  0xa5   : > { %1161 = vmatpush3.msra.mxu1 %v294_v35  ;;  %731 = vmatprep.subr.mxu0 %v482_v36  ;;  %v393_v34 = vld [vmem:[%s1662_s22 + $0x3e8] sm:$0xff]  ;;  %v532_v35 = vld [vmem:[%s1662_s22 + $0x840] sm:$0xff]  ;;  %v438_v36 = vld [vmem:[%s1662_s22 + $0x550] sm:$0xff] }
  0xa6   : > { %1162 = vmatprep.subr.mxu1 %v339_v37  ;;  %732 = vmatpush1.msra.mxu0 %v481_v38  ;;  %v530_v37 = vld [vmem:[%s1662_s22 + $0x830] sm:$0xff] }
  0xa7   : > { %1163 = vmatpush3.msra.mxu1 %v291_v39  ;;  %733 = vmatprep.subr.mxu0 %v479_v40  ;;  %v390_v38 = vld [vmem:[%s1662_s22 + $0x3d0] sm:$0xff]  ;;  %v529_v39 = vld [vmem:[%s1662_s22 + $0x828] sm:$0xff]  ;;  %v435_v40 = vld [vmem:[%s1662_s22 + $0x538] sm:$0xff] }
  0xa8   : > { %1164 = vmatprep.subr.mxu1 %v336_v41  ;;  %734 = vmatpush1.msra.mxu0 %v478_v42  ;;  %v527_v41 = vld [vmem:[%s1662_s22 + $0x818] sm:$0xff] }
  0xa9   : > { %1165 = vmatpush3.msra.mxu1 %v288_v43  ;;  %735 = vmatprep.subr.mxu0 %v476_v44  ;;  %v387_v42 = vld [vmem:[%s1662_s22 + $0x3b8] sm:$0xff]  ;;  %v526_v43 = vld [vmem:[%s1662_s22 + $0x810] sm:$0xff]  ;;  %v432_v44 = vld [vmem:[%s1662_s22 + $0x520] sm:$0xff] }
  0xaa   : > { %1166 = vmatprep.subr.mxu1 %v333_v45  ;;  %736 = vmatpush1.msra.mxu0 %v475_v46  ;;  %v524_v45 = vld [vmem:[%s1662_s22 + $0x800] sm:$0xff] }
  0xab   : > { %1167 = vmatpush3.msra.mxu1 %v285_v47  ;;  %737 = vmatprep.subr.mxu0 %v473_v48  ;;  %v384_v46 = vld [vmem:[%s1662_s22 + $0x3a0] sm:$0xff]  ;;  %v523_v47 = vld [vmem:[%s1662_s22 + $0x7f8] sm:$0xff]  ;;  %v429_v48 = vld [vmem:[%s1662_s22 + $0x508] sm:$0xff] }
  0xac   : > { %1168 = vmatprep.subr.mxu1 %v330_v49  ;;  %738 = vmatpush1.msra.mxu0 %v472_v50  ;;  %v521_v49 = vld [vmem:[%s1662_s22 + $0x7e8] sm:$0xff] }
  0xad   : > { %1169 = vmatpush3.msra.mxu1 %v282_v51  ;;  %739 = vmatprep.subr.mxu0 %v470_v52  ;;  %v381_v50 = vld [vmem:[%s1662_s22 + $0x388] sm:$0xff]  ;;  %v520_v51 = vld [vmem:[%s1662_s22 + $0x7e0] sm:$0xff]  ;;  %v426_v52 = vld [vmem:[%s1662_s22 + $0x4f0] sm:$0xff] }
  0xae   : > { %1170 = vmatprep.subr.mxu1 %v327_v53  ;;  %740 = vmatpush1.msra.mxu0 %v469_v54  ;;  %v518_v53 = vld [vmem:[%s1662_s22 + $0x7d0] sm:$0xff] }
  0xaf   : > { %1171 = vmatpush3.msra.mxu1 %v279_v55  ;;  %741 = vmatprep.subr.mxu0 %v467_v56  ;;  %v378_v54 = vld [vmem:[%s1662_s22 + $0x370] sm:$0xff]  ;;  %v517_v55 = vld [vmem:[%s1662_s22 + $0x7c8] sm:$0xff]  ;;  %v423_v56 = vld [vmem:[%s1662_s22 + $0x4d8] sm:$0xff] }
  0xb0   : > { %1172 = vmatprep.subr.mxu1 %v324_v57  ;;  %742 = vmatpush1.msra.mxu0 %v466_v58  ;;  %v515_v57 = vld [vmem:[%s1662_s22 + $0x7b8] sm:$0xff] }
  0xb1   : > { %1173 = vmatpush3.msra.mxu1 %v276_v59  ;;  %743 = vmatprep.subr.mxu0 %v464_v60  ;;  %v375_v58 = vld [vmem:[%s1662_s22 + $0x358] sm:$0xff]  ;;  %v514_v59 = vld [vmem:[%s1662_s22 + $0x7b0] sm:$0xff]  ;;  %v420_v60 = vld [vmem:[%s1662_s22 + $0x4c0] sm:$0xff] }
  0xb2   : > { %1174 = vmatprep.subr.mxu1 %v321_v61  ;;  %744 = vmatpush1.msra.mxu0 %v463_v62  ;;  %v512_v61 = vld [vmem:[%s1662_s22 + $0x7a0] sm:$0xff] }
  0xb3   : > { %1175 = vmatpush3.msra.mxu1 %v273_v0  ;;  %745 = vmatprep.subr.mxu0 %v461_v3  ;;  %v372_v62 = vld [vmem:[%s1662_s22 + $0x340] sm:$0xff]  ;;  %v511_v0 = vld [vmem:[%s1662_s22 + $0x798] sm:$0xff]  ;;  %v417_v3 = vld [vmem:[%s1662_s22 + $0x4a8] sm:$0xff] }
  0xb4   : > { %1176 = vmatprep.subr.mxu1 %v318_v4  ;;  %746 = vmatpush1.msra.mxu0 %v460_v6  ;;  %v509_v4 = vld [vmem:[%s1662_s22 + $0x788] sm:$0xff] }
  0xb5   : > { %1177 = vmatpush3.msra.mxu1 %v270_v7  ;;  %747 = vmatprep.subr.mxu0 %v554_v8  ;;  %v369_v6 = vld [vmem:[%s1662_s22 + $0x328] sm:$0xff]  ;;  %v508_v7 = vld [vmem:[%s1662_s22 + $0x780] sm:$0xff]  ;;  %v414_v8 = vld [vmem:[%s1662_s22 + $0x490] sm:$0xff] }
  0xb6   : > { %850 = vmatprep.mubr.f32.mxu1 %v1795_v63  ;;  %1181 = vmatprep.subr.mxu1 %v459_v9  ;;  %v453_v63 = vld [vmem:[%s1662_s22 + $0x5c8] sm:$0xff]  ;;  %v267_v9 = vld [vmem:[#allocation2 + $0x28] sm:$0xff] }
  0xb7   : > { %748 = vmatpush2.msra.mxu0 %v553_v10  ;;  %851 = vmatmul.mubr.f32.vlgmr.msra.gmra.mxu1 %v1798_v1  ;;  %v450_v1 = vld [vmem:[%s1662_s22 + $0x5b0] sm:$0xff] }
  0xb8   : > { %749 = vmatprep.subr.mxu0 %v551_v11  ;;  %1182 = vmatpush3.msra.mxu1 %v411_v12  ;;  %v366_v10 = vld [vmem:[%s1662_s22 + $0x310] sm:$0xff]  ;;  %v555_v12 = vld [vmem:[%s1662_s22 + $0x8f8] sm:$0xff] }
  0xb9   : > { %750 = vmatpush2.msra.mxu0 %v550_v13  ;;  %1183 = vmatprep.subr.mxu1 %v456_v14  ;;  %v1938_v11 = vld [vmem:[#allocation2 + $0x20] sm:$0xff]  ;;  %v507_v13 = vld [vmem:[%s1662_s22 + $0x778] sm:$0xff]  ;;  %v552_v14 = vld [vmem:[%s1662_s22 + $0x8e0] sm:$0xff] }
  0xba   : > { %751 = vmatprep.subr.mxu0 %v548_v15  ;;  %1184 = vmatpush3.msra.mxu1 %v408_v16  ;;  %v504_v15 = vld [vmem:[%s1662_s22 + $0x760] sm:$0xff]  ;;  %v549_v16 = vld [vmem:[%s1662_s22 + $0x8c8] sm:$0xff] }
  0xbb   : > { %752 = vmatpush2.msra.mxu0 %v547_v17  ;;  %1185 = vmatprep.subr.mxu1 %v453_v63  ;;  %v501_v17 = vld [vmem:[%s1662_s22 + $0x748] sm:$0xff]  ;;  %v498_v63 = vld [vmem:[%s1662_s22 + $0x730] sm:$0xff] }
  0xbc   : > { %753 = vmatprep.subr.mxu0 %v545_v18  ;;  %1186 = vmatpush3.msra.mxu1 %v405_v19  ;;  %v495_v18 = vld [vmem:[%s1662_s22 + $0x718] sm:$0xff]  ;;  %v540_v19 = vld [vmem:[%s1662_s22 + $0x880] sm:$0xff] }
  0xbd   : > { %754 = vmatpush2.msra.mxu0 %v544_v20  ;;  %1187 = vmatprep.subr.mxu1 %v450_v1  ;;  %v492_v20 = vld [vmem:[%s1662_s22 + $0x700] sm:$0xff]  ;;  %v537_v1 = vld [vmem:[%s1662_s22 + $0x868] sm:$0xff] }
  0xbe   : > { %755 = vmatprep.subr.mxu0 %v542_v21  ;;  %1188 = vmatpush3.msra.mxu1 %v402_v22  ;;  %v489_v21 = vld [vmem:[%s1662_s22 + $0x6e8] sm:$0xff]  ;;  %v534_v22 = vld [vmem:[%s1662_s22 + $0x850] sm:$0xff] }
  0xbf   : > { %756 = vmatpush2.msra.mxu0 %v541_v23  ;;  %1189 = vmatprep.subr.mxu1 %v447_v24  ;;  %v486_v23 = vld [vmem:[%s1662_s22 + $0x6d0] sm:$0xff]  ;;  %v531_v24 = vld [vmem:[%s1662_s22 + $0x838] sm:$0xff] }
  0xc0   : > { %757 = vmatprep.subr.mxu0 %v539_v25  ;;  %1190 = vmatpush3.msra.mxu1 %v399_v26  ;;  %v483_v25 = vld [vmem:[%s1662_s22 + $0x6b8] sm:$0xff]  ;;  %v528_v26 = vld [vmem:[%s1662_s22 + $0x820] sm:$0xff] }
  0xc1   : > { %758 = vmatpush2.msra.mxu0 %v538_v27  ;;  %1191 = vmatprep.subr.mxu1 %v444_v28  ;;  %v480_v27 = vld [vmem:[%s1662_s22 + $0x6a0] sm:$0xff]  ;;  %v525_v28 = vld [vmem:[%s1662_s22 + $0x808] sm:$0xff] }
  0xc2   : > { %759 = vmatprep.subr.mxu0 %v536_v29  ;;  %1192 = vmatpush3.msra.mxu1 %v396_v30  ;;  %v477_v29 = vld [vmem:[%s1662_s22 + $0x688] sm:$0xff]  ;;  %v522_v30 = vld [vmem:[%s1662_s22 + $0x7f0] sm:$0xff] }
  0xc3   : > { %760 = vmatpush2.msra.mxu0 %v535_v31  ;;  %1193 = vmatprep.subr.mxu1 %v441_v32  ;;  %v474_v31 = vld [vmem:[%s1662_s22 + $0x670] sm:$0xff]  ;;  %v519_v32 = vld [vmem:[%s1662_s22 + $0x7d8] sm:$0xff] }
  0xc4   : > { %761 = vmatprep.subr.mxu0 %v533_v33  ;;  %1194 = vmatpush3.msra.mxu1 %v393_v34  ;;  %v471_v33 = vld [vmem:[%s1662_s22 + $0x658] sm:$0xff]  ;;  %v516_v34 = vld [vmem:[%s1662_s22 + $0x7c0] sm:$0xff] }
  0xc5   : > { %762 = vmatpush2.msra.mxu0 %v532_v35  ;;  %1195 = vmatprep.subr.mxu1 %v438_v36  ;;  %v468_v35 = vld [vmem:[%s1662_s22 + $0x640] sm:$0xff]  ;;  %v513_v36 = vld [vmem:[%s1662_s22 + $0x7a8] sm:$0xff] }
  0xc6   : > { %763 = vmatprep.subr.mxu0 %v530_v37  ;;  %1196 = vmatpush3.msra.mxu1 %v390_v38  ;;  %v465_v37 = vld [vmem:[%s1662_s22 + $0x628] sm:$0xff]  ;;  %v510_v38 = vld [vmem:[%s1662_s22 + $0x790] sm:$0xff] }
  0xc7   : > { %764 = vmatpush2.msra.mxu0 %v529_v39  ;;  %1197 = vmatprep.subr.mxu1 %v435_v40  ;;  %v462_v39 = vld [vmem:[%s1662_s22 + $0x610] sm:$0xff]  ;;  %v558_v40 = vlaneseq }
  0xc8   : > { %765 = vmatprep.subr.mxu0 %v527_v41  ;;  %1198 = vmatpush3.msra.mxu1 %v387_v42 }
  0xc9   : > { %766 = vmatpush2.msra.mxu0 %v526_v43  ;;  %1199 = vmatprep.subr.mxu1 %v432_v44  ;;  %v559_v41 = vshrl.u32 %v558_v40, 7  ;;  %v556_v43 = vld [vmem:[%s231_s20] sm:$0x7] }
  0xca   : > { %767 = vmatprep.subr.mxu0 %v524_v45  ;;  %1200 = vmatpush3.msra.mxu1 %v384_v46 }
  0xcb   : > { %768 = vmatpush2.msra.mxu0 %v523_v47  ;;  %1201 = vmatprep.subr.mxu1 %v429_v48  ;;  %v560_v42 = vsub.s32 0, %v559_v41  ;;  %v564_v44 = vsub.s32 1, %v559_v41 }
  0xcc   : > { %769 = vmatprep.subr.mxu0 %v521_v49  ;;  %1202 = vmatpush3.msra.mxu1 %v381_v50 }
  0xcd   : > { %770 = vmatpush2.msra.mxu0 %v520_v51  ;;  %1203 = vmatprep.subr.mxu1 %v426_v52  ;;  %v561_v46 = vrot.slane %v556_v43, %v560_v42  ;;  %v565_v47 = vrot.slane %v556_v43, %v564_v44 }
  0xce   : > { %771 = vmatprep.subr.mxu0 %v518_v53  ;;  %1204 = vmatpush3.msra.mxu1 %v378_v54 }
  0xcf   : > { %772 = vmatpush2.msra.mxu0 %v517_v55  ;;  %1205 = vmatprep.subr.mxu1 %v423_v56 }
  0xd0   : > { %773 = vmatprep.subr.mxu0 %v515_v57  ;;  %1206 = vmatpush3.msra.mxu1 %v375_v58 }
  0xd1   : > { %774 = vmatpush2.msra.mxu0 %v514_v59  ;;  %1207 = vmatprep.subr.mxu1 %v420_v60 }
  0xd2   : > { %775 = vmatprep.subr.mxu0 %v512_v61  ;;  %1208 = vmatpush3.msra.mxu1 %v372_v62  ;;  %v568_v61 = vsub.s32 2, %v559_v41 }
  0xd3   : > { %776 = vmatpush2.msra.mxu0 %v511_v0  ;;  %1209 = vmatprep.subr.mxu1 %v417_v3 }
  0xd4   : > { %777 = vmatprep.subr.mxu0 %v509_v4  ;;  %1210 = vmatpush3.msra.mxu1 %v369_v6  ;;  %v569_v0 = vrot.slane %v556_v43, %v568_v61 }
  0xd5   : > { %778 = vmatpush2.msra.mxu0 %v508_v7  ;;  %1211 = vmatprep.subr.mxu1 %v414_v8 }
  0xd6   : > { %779 = vmatprep.mubr.f32.mxu0 %v267_v9  ;;  %1212 = vmatpush3.msra.mxu1 %v366_v10 }
  0xd7   : > { %920 = vmatprep.mubr.f32.mxu1 %v1800_v2  ;;  %780 = vmatmul.mubr.f32.vlgmr.msra.gmra.mxu0 %v1938_v11  ;;  %v546_v2 = vld [vmem:[%s1662_s22 + $0x8b0] sm:$0xff] }
  0xd8   : > { %921 = vmatmul.mubr.f32.vlgmr.msra.gmra.mxu1 %v1805_v5  ;;  %1216 = vmatprep.subr.mxu0 %v555_v12  ;;  %v543_v5 = vld [vmem:[%s1662_s22 + $0x898] sm:$0xff] }
  0xd9   : > { %990 = vmatprep.mubr.f32.mxu0 %v267_v9  ;;  %1217 = vmatpush3.msra.mxu0 %v507_v13 }
  0xda   : > { %1218 = vmatprep.subr.mxu0 %v552_v14 }
  0xdb   : > { %1219 = vmatpush3.msra.mxu0 %v504_v15 }
  0xdc   : > { %1220 = vmatprep.subr.mxu0 %v549_v16 }
  0xdd   : > { %1221 = vmatpush3.msra.mxu0 %v501_v17 }
  0xde   : > { %1222 = vmatprep.subr.mxu0 %v546_v2 }
  0xdf   : > { %1223 = vmatpush3.msra.mxu0 %v498_v63 }
  0xe0   : > { %1224 = vmatprep.subr.mxu0 %v543_v5 }
  0xe1   : > { %1225 = vmatpush3.msra.mxu0 %v495_v18 }
  0xe2   : > { %1226 = vmatprep.subr.mxu0 %v540_v19 }
  0xe3   : > { %1227 = vmatpush3.msra.mxu0 %v492_v20 }
  0xe4   : > { %1228 = vmatprep.subr.mxu0 %v537_v1 }
  0xe5   : > { %1229 = vmatpush3.msra.mxu0 %v489_v21 }
  0xe6   : > { %1230 = vmatprep.subr.mxu0 %v534_v22 }
  0xe7   : > { %1231 = vmatpush3.msra.mxu0 %v486_v23 }
  0xe8   : > { %1232 = vmatprep.subr.mxu0 %v531_v24 }
  0xe9   : > { %1233 = vmatpush3.msra.mxu0 %v483_v25 }
  0xea   : > { %1234 = vmatprep.subr.mxu0 %v528_v26 }
  0xeb   : > { %1235 = vmatpush3.msra.mxu0 %v480_v27 }
  0xec   : > { %1236 = vmatprep.subr.mxu0 %v525_v28 }
  0xed   : > { %1237 = vmatpush3.msra.mxu0 %v477_v29 }
  0xee   : > { %1238 = vmatprep.subr.mxu0 %v522_v30 }
  0xef   : > { %1239 = vmatpush3.msra.mxu0 %v474_v31 }
  0xf0   : > { %1240 = vmatprep.subr.mxu0 %v519_v32 }
  0xf1   : > { %1241 = vmatpush3.msra.mxu0 %v471_v33 }
  0xf2   : > { %1242 = vmatprep.subr.mxu0 %v516_v34 }
  0xf3   : > { %1243 = vmatpush3.msra.mxu0 %v468_v35 }
  0xf4   : > { %1244 = vmatprep.subr.mxu0 %v513_v36 }
  0xf5   : > { %1245 = vmatpush3.msra.mxu0 %v465_v37 }
  0xf6   : > { %1246 = vmatprep.subr.mxu0 %v510_v38 }
  0xf7   : > { %1247 = vmatpush3.msra.mxu0 %v462_v39 }
  0xf8   : > { %991 = vmatmul.mubr.f32.vlgmr.msra.gmra.mxu0 %v1938_v11 }
 0x154   : > { %v639_v45 = vpop.f32.mrf.mxu0 }
 0x155   : > { %v640_v50 = vadd.f32 %v639_v45, %v561_v46 }
 0x156   : > { %v641_v48 = vpop.f32.mrf.mxu0  ;;  %v710_v49 = vpop.f32.mrf.mxu1 }
 0x157   : > { %v642_v51 = vadd.f32 %v641_v48, %v565_v47  ;;  %v711_v53 = vadd.f32 %v710_v49, %v640_v50 }
 0x158   : > { %v712_v52 = vpop.f32.mrf.mxu1 }
 0x159   : > { %v713_v55 = vadd.f32 %v712_v52, %v642_v51 }
 0x177   : > { %v1178_v59 = vpop.f32.mrf.mxu1 }
 0x179   : > { %v1179_v60 = vpop.f32.mrf.mxu1 }
 0x17a   : > { %v1180_v3 = vadd.f32 %v1179_v60, %v1178_v59 }
 0x17c   : > { %v853_v6 = vadd.f32 %v1180_v3, %v569_v0 }
 0x197   : > { %v781_v54 = vpop.f32.mrf.mxu0 }
 0x198   : > { %v782_v56 = vadd.f32 %v781_v54, %v711_v53  ;;  %v1213_v62 = vpop.f32.mrf.mxu1 }
 0x199   : > { %v783_v57 = vpop.f32.mrf.mxu0 }
 0x19a   : > { %996 = vst [vmem:[%s258_s28] sm:$0xff] %v782_v56  ;;  %v784_v58 = vadd.f32 %v783_v57, %v713_v55  ;;  %v1214_v4 = vpop.f32.mrf.mxu1 }
 0x19b   : > { %v1215_v7 = vadd.f32 %v1214_v4, %v1213_v62 }
 0x19c   : > { %997 = vst [vmem:[%s258_s28 + $0x8] sm:$0xff] %v784_v58 }
 0x19d   : > { %v923_v10 = vadd.f32 %v1215_v7, %v853_v6 }
 0x1b8   : > { %v1248_v8 = vpop.f32.mrf.mxu0 }
 0x1ba   : > { %v1249_v9 = vpop.f32.mrf.mxu0 }
 0x1bb   : > { %v1250_v11 = vadd.f32 %v1249_v9, %v1248_v8 }
 0x1bd   : > { %v993_v12 = vadd.f32 %v1250_v11, %v923_v10 }
 0x1bf   : > { %998 = vst [vmem:[%s258_s28 + $0x10] sm:$0xff] %v993_v12 }
 0x1c0   : > { %1432 = shalt.err (!%p1429_p6)
}
 0x1c1   : > { %s1433_s10 = scalar_lea.hbm %s1014_s27, 384  ;;  %s1437_s22 = scalar_lea.hbm %s2021_s3, 768 }
 0x1c2   : > { %p1434_p8 = scmp.ne.s32.totalorder %s1014_s27, %s1433_s10  ;;  %p1438_p1 = scmp.lt.s32.totalorder %s1014_s27, %s2021_s3 }
 0x1c3   : > { %p1439_p5 = scmp.lt.s32.totalorder %s1437_s22, %s1433_s10 }
 0x1c4   : > { %p1435_p13 = pnand %p1434_p8, %p2037_p2 }
 0x1c5   : > { %p1440_p7 = por %p1439_p5, %p1438_p1 }
 0x1c6   : > { %p1436_p12 = pneg %p1435_p13 }
 0x1c8   : > { %p1441_p10 = pnand %p1440_p7, %p1436_p12 }
 0x1ca   : > { %1444 = shalt.err (!%p1441_p10)
}
 0x1cb   : > { %1264 = dma.vmem_to_hbm [thread:$0]  (%p2037_p2), %s1017_s11, 384, %s1014_s27, %s1000_s30  }
 0x1cc PF: > { %s1028_s23 = sand.u32 1, %s1483_s12   ;;  %p2038_p9 = scmp.ne.s32.totalorder %s2030_s26, 0 }
 0x1cd   : > { %p2039_p11 = scmp.ge.s32.totalorder %s1503_s17, 2  ;;  %s1029_s28 = scalar_lea.sflag [#allocation4], %s1028_s23 }
 0x1cf   : > { %p1278_p0 = pnand %p2039_p11, %p2038_p9 }
 0x1d1   : > { %p1279_p3 = pneg %p1278_p0 }
 0x1d3   : > { %1478 = dma.done.wait (%p1279_p3), %s1029_s28, 384  }
 0x1d4   : > { %1480 = vsyncadd (%p1279_p3), %s1029_s28, 4294966912  ;;  %s20_s17 = sadd.s32 1, %s1503_s17   ;;  %s2040_s12 = smov %s1487_s13 }
 0x1d5   : > { %p17_p4 = scmp.ge.s32.totalorder %s20_s17, 4   ;;  %s2041_s13 = smov %s1491_s14 }
 0x1d6   : > { %s2042_s14 = smov %s1580_s24  ;;  %s2043_s15 = smov %s1499_s16 }
 0x1d7   : > { %s2044_s16 = smov %s2046_s18  ;;  %19 = sbr.rel (!%p17_p4) target bundleno = 7 (0x7), region = 94 }
 0x1dc   :  { %1034 = vsyncpa [#allocation3], 1 }
 0x1dd   :  { %1036 = vsyncpa [#allocation3 + $0x1], 1 }
 0x1de   :  { %1037 = vsyncpa [#allocation6], 1 }
 0x1df   :  { %1039 = vsyncpa [#allocation6 + $0x1], 1 }
 0x1e0   :  { %1040 = vsyncpa [#allocation4], 1 }
 0x1e1   :  { %1042 = vsyncpa [#allocation4 + $0x1], 1 }

</bundles_post_ra>
